<compile_context>
chip_gen: v5e
topology: v5e:2x2
jax: 0.10.0
libtpu: 0.0.40
codegen_flags: <defaults>
</compile_context>

<pallas_src>
import math

import jax
import jax.numpy as jnp
from jax.experimental import pallas as pl
from jax.experimental.pallas import tpu as pltpu

_MIB = 1024 * 1024
_FUSED_W_BUDGET = 16 * _MIB     # max bytes for a precomputed fused [K, N] weight
_MIN_GRID_STEPS = 4             # keep >=4 grid steps so v7x's 2 TCs both get work


def _round_up(x, m):
    return -(-x // m) * m


def _vmem_capacity_bytes():
    """Physical per-core VMEM (128 MiB on v5e/v6e, 64 MiB on v7x)."""
    try:
        cap = getattr(pltpu.get_tpu_info(), "vmem_capacity_bytes", None)
        if cap:
            return int(cap)
    except Exception:
        pass
    return 128 * _MIB


def _vmem_budget():
    """(tile-picking budget, vmem_limit_bytes cap) for this TPU generation."""
    cap = _vmem_capacity_bytes()
    if cap <= 64 * _MIB:                 # v7x: leave compiler/internal-scratch headroom
        return 48 * _MIB, 56 * _MIB
    return 100 * _MIB, 110 * _MIB        # v5e / v6e: use most of the 128 MiB


def _pick_tile_rows(m_rows, bytes_per_row, avail_bytes, align, min_steps):
    """Largest row tile (aligned to `align`) whose pipelined buffers fit
    `avail_bytes`, capped so the grid keeps >= `min_steps` steps when m_rows
    allows (dual-TensorCore sharding on v7x)."""
    m_aligned = _round_up(max(m_rows, 1), align)
    cap = max(align, _round_up(-(-m_rows // min_steps), align))
    cap = min(cap, m_aligned)
    tile = align
    for cand in (8192, 4096, 2048, 1024, 512, 256, 128, 64, 32, 16, 8):
        if cand % align or cand > cap:
            continue
        if cand * bytes_per_row <= avail_bytes:
            tile = cand
            break
    return min(tile, cap)


# ---------------------------------------------------------------------------
# Kernels
# ---------------------------------------------------------------------------

def _fused_kernel(x_ref, w_ref, b_ref, o_ref):
    # x_ref: [TILE_M, fold*K]   (fold rows packed into lanes -> lane-dense loads)
    # w_ref: [fold*K, fold*N]   (block-diagonal fused weight, VMEM-resident)
    # b_ref: [1, fold*N] f32    (bias, tiled per folded row, resident)
    # o_ref: [TILE_M, fold*N]   (lane-dense, unmasked stores)
    acc = jnp.dot(x_ref[...], w_ref[...], preferred_element_type=jnp.float32)
    o_ref[...] = (acc + b_ref[...]).astype(o_ref.dtype)


def _two_dot_kernel(x_ref, w0t_ref, w2t_ref, b_ref, o_ref):
    # Fallback for large K*N / large r: keep two dots with r padded to 128.
    h = jnp.dot(x_ref[...], w0t_ref[...], preferred_element_type=jnp.float32)
    # NOTE: h is cast to the weight dtype before the second dot (identity in
    # f32); a deliberate speed/accuracy tradeoff when weights run in bf16 — it
    # gives up the f32 accumulation of the first matmul for the fast MXU path.
    out = jnp.dot(h.astype(w2t_ref.dtype), w2t_ref[...],
                  preferred_element_type=jnp.float32)
    o_ref[...] = (out + b_ref[...]).astype(o_ref.dtype)


# ---------------------------------------------------------------------------
# Parameter preparation (hoisted out of the per-call hot path)
# ---------------------------------------------------------------------------

def prepare_svd_dec_params(w0, w2, b2, x_dtype=jnp.float32):
    """One-time weight prep.  w0: [r, K] (lin0.weight), w2: [N, r] (lin2.weight),
    b2: [N] (lin2.bias).  Returns params consumed by svd_dec_apply()."""
    r, K = w0.shape
    N = w2.shape[0]
    dtype_bytes = jnp.dtype(x_dtype).itemsize
    tile_budget, _ = _vmem_budget()
    hp = jax.lax.Precision.HIGHEST

    # Fuse the rank-r factors into one [K, N] weight whenever that is small
    # enough to keep resident and at least as cheap as two dots (always true
    # for tiny r or narrow N, where it also removes the narrow intermediate).
    fused_bytes = K * N * dtype_bytes
    fuse = fused_bytes <= _FUSED_W_BUDGET and (
        N < 128 or r <= 32 or r * (K + N) >= K * N)

    if fuse:
        w_fused = jnp.dot(w0.T.astype(jnp.float32), w2.T.astype(jnp.float32),
                          precision=hp)                       # [K, N], f32

        # Lane-dense output: pack `fold` consecutive rows into the lane axis so
        # stores are a multiple of 128 lanes wide when N < 128.
        fold = 1
        if N < 128:
            fold = 128 // math.gcd(N, 128)
            # Keep the (double-buffered) block-diagonal weight modest in VMEM.
            while fold > 1 and 2 * (fold * K) * (fold * N) * dtype_bytes > tile_budget // 4:
                fold //= 2
        if fold > 1:
            w_fused = jnp.kron(jnp.eye(fold, dtype=jnp.float32), w_fused)
            bias = jnp.tile(b2.astype(jnp.float32), fold).reshape(1, fold * N)
        else:
            bias = b2.astype(jnp.float32).reshape(1, N)
        return dict(mode="fused", K=K, N=N, r=r, fold=fold,
                    w=w_fused.astype(x_dtype), b=bias)

    # Fallback: two dots, with r zero-padded to a multiple of 128 so the second
    # matmul's contraction dim fills the MXU lanes (zero cols/rows are exact).
    r_pad = _round_up(r, 128)
    w0t = w0.T.astype(x_dtype)                  # [K, r]
    w2t = w2.T.astype(x_dtype)                  # [r, N]
    if r_pad != r:
        w0t = jnp.pad(w0t, ((0, 0), (0, r_pad - r)))
        w2t = jnp.pad(w2t, ((0, r_pad - r), (0, 0)))
    bias = b2.astype(jnp.float32).reshape(1, N)
    return dict(mode="two_dot", K=K, N=N, r=r, r_pad=r_pad,
                w0t=w0t, w2t=w2t, b=bias)


# ---------------------------------------------------------------------------
# Forward
# ---------------------------------------------------------------------------

def svd_dec_apply(params, x):
    """out = lin2(lin0(x)); x: [..., K] -> [..., N]."""
    *lead, K = x.shape
    assert K == params["K"]
    N = params["N"]
    dtype_bytes = jnp.dtype(x.dtype).itemsize
    # Sublane alignment: 8 rows for f32, 16 for bf16, 32 for 1-byte dtypes.
    align = max(8, 32 // dtype_bytes)
    tile_budget, vmem_cap = _vmem_budget()

    M = 1
    for d in lead:
        M *= d
    x2d = x.reshape(M, K)

    if params["mode"] == "fused":
        fold = params["fold"]
        w, b = params["w"], params["b"]           # [fold*K, fold*N], [1, fold*N]
        lane_k, lane_n = fold * K, fold * N

        m_rows = -(-M // fold)                    # folded row count
        # Resident (double-buffered) weight/bias footprint comes off the budget.
        resident = 2 * (w.size * w.dtype.itemsize + b.size * b.dtype.itemsize)
        # Per-row tile bytes: double-buffered x/out tiles + f32 accumulator.
        bytes_per_row = 2 * (lane_k + lane_n) * dtype_bytes + lane_n * 4
        tile_m = _pick_tile_rows(m_rows, bytes_per_row,
                                 max(tile_budget - resident, _MIB),
                                 align, _MIN_GRID_STEPS)
        m_rows_pad = _round_up(m_rows, tile_m)
        m_pad = m_rows_pad * fold
        if m_pad != M:
            x2d = jnp.pad(x2d, ((0, m_pad - M), (0, 0)))
        x_folded = x2d.reshape(m_rows_pad, lane_k)   # fold rows into lanes (free on HBM)

        need = resident + tile_m * bytes_per_row
        vmem_limit = int(min(vmem_cap, max(32 * _MIB, int(1.25 * need))))
        cost = pl.CostEstimate(
            flops=2 * m_rows_pad * lane_k * lane_n,
            transcendentals=0,
            bytes_accessed=(m_rows_pad * (lane_k + lane_n) * dtype_bytes
                            + w.size * w.dtype.itemsize
                            + b.size * b.dtype.itemsize))

        out = pl.pallas_call(
            _fused_kernel,
            out_shape=jax.ShapeDtypeStruct((m_rows_pad, lane_n), x.dtype),
            grid=(m_rows_pad // tile_m,),
            in_specs=[
                pl.BlockSpec((tile_m, lane_k), lambda i: (i, 0)),   # x tile, pipelined over M
                pl.BlockSpec((lane_k, lane_n), lambda i: (0, 0)),   # fused weight, resident
                pl.BlockSpec((1, lane_n), lambda i: (0, 0)),        # bias, resident
            ],
            out_specs=pl.BlockSpec((tile_m, lane_n), lambda i: (i, 0)),
            compiler_params=pltpu.CompilerParams(
                dimension_semantics=("parallel",),                  # dual-TC sharding on v7x
                vmem_limit_bytes=vmem_limit),
            cost_estimate=cost,
        )(x_folded, w, b)

        out2d = out.reshape(m_pad, N)[:M]
        return out2d.reshape(*lead, N)

    # ----- two-dot fallback (large K*N or large r) -----
    w0t, w2t, b = params["w0t"], params["w2t"], params["b"]
    r_pad = params["r_pad"]
    resident = 2 * ((w0t.size + w2t.size) * dtype_bytes + b.size * 4)
    bytes_per_row = 2 * (K + N) * dtype_bytes + (r_pad + N) * 4   # h + acc are f32
    tile_m = _pick_tile_rows(M, bytes_per_row,
                             max(tile_budget - resident, _MIB),
                             align, _MIN_GRID_STEPS)
    m_pad = _round_up(M, tile_m)
    if m_pad != M:
        x2d = jnp.pad(x2d, ((0, m_pad - M), (0, 0)))

    need = resident + tile_m * bytes_per_row
    vmem_limit = int(min(vmem_cap, max(32 * _MIB, int(1.25 * need))))
    cost = pl.CostEstimate(
        flops=2 * m_pad * K * r_pad + 2 * m_pad * r_pad * N,
        transcendentals=0,
        bytes_accessed=(m_pad * (K + N) + K * r_pad + r_pad * N + N) * dtype_bytes)

    # TODO(synk): pipeline_mode=pl.Buffered(1) on the three resident specs below
    # would halve their VMEM footprint; the budget above conservatively assumes
    # double buffering instead.
    # TODO(synk): if N < 128 ever reaches this path (huge K*N), stores are still
    # masked; it would need an in-kernel lane fold or a K-tiled grid.
    out2d = pl.pallas_call(
        _two_dot_kernel,
        out_shape=jax.ShapeDtypeStruct((m_pad, N), x.dtype),
        grid=(m_pad // tile_m,),
        in_specs=[
            pl.BlockSpec((tile_m, K), lambda i: (i, 0)),   # x tile, pipelined over M
            pl.BlockSpec((K, r_pad), lambda i: (0, 0)),    # lin0 weight (r padded), resident
            pl.BlockSpec((r_pad, N), lambda i: (0, 0)),    # lin2 weight (r padded), resident
            pl.BlockSpec((1, N), lambda i: (0, 0)),        # bias, resident
        ],
        out_specs=pl.BlockSpec((tile_m, N), lambda i: (i, 0)),
        compiler_params=pltpu.CompilerParams(
            dimension_semantics=("parallel",),
            vmem_limit_bytes=vmem_limit),
        cost_estimate=cost,
    )(x2d, w0t, w2t, b)

    return out2d[:M].reshape(*lead, N)


def svd_dec_forward(x, w0, w2, b2):
    """Convenience one-shot wrapper (prefer prepare once + apply per call)."""
    return svd_dec_apply(prepare_svd_dec_params(w0, w2, b2, x.dtype), x)


def _reference(x, w0, w2, b2):
    hp = jax.lax.Precision.HIGHEST
    h = jnp.dot(x, w0.T, precision=hp)
    return jnp.dot(h, w2.T, precision=hp) + b2


if __name__ == "__main__":
    # --- Primary test: small shapes consistent with the module (fused + lane-dense fold path) ---
    batch, seq = 2, 8
    input_size, r, output_size = 32, 8, 16

    key = jax.random.PRNGKey(0)
    kx, k0, k2, kb = jax.random.split(key, 4)
    x = jax.random.normal(kx, (batch, seq, input_size), dtype=jnp.float32)
    w0 = jax.random.normal(k0, (r, input_size), dtype=jnp.float32) * 0.1    # lin0.weight
    w2 = jax.random.normal(k2, (output_size, r), dtype=jnp.float32) * 0.1   # lin2.weight
    b2 = jax.random.normal(kb, (output_size,), dtype=jnp.float32) * 0.1     # lin2.bias

    params = prepare_svd_dec_params(w0, w2, b2, x.dtype)   # hoisted, done once
    out = jax.block_until_ready(svd_dec_apply(params, x))
    ref = _reference(x, w0, w2, b2)
    assert out.shape == (batch, seq, output_size)
    assert jnp.allclose(out, ref, atol=1e-4, rtol=1e-4)

    # --- Secondary test: exercise the two-dot fallback (larger r, lane-wide N) ---
    K2, R2, N2 = 256, 64, 128
    kx2, k02, k22, kb2 = jax.random.split(jax.random.PRNGKey(1), 4)
    x2 = jax.random.normal(kx2, (batch, seq, K2), dtype=jnp.float32)
    w0b = jax.random.normal(k02, (R2, K2), dtype=jnp.float32) * 0.05
    w2b = jax.random.normal(k22, (N2, R2), dtype=jnp.float32) * 0.05
    b2b = jax.random.normal(kb2, (N2,), dtype=jnp.float32) * 0.05
    params2 = prepare_svd_dec_params(w0b, w2b, b2b, x2.dtype)
    out2 = jax.block_until_ready(svd_dec_apply(params2, x2))
    ref2 = _reference(x2, w0b, w2b, b2b)
    assert out2.shape == (batch, seq, N2)
    assert jnp.allclose(out2, ref2, atol=1e-4, rtol=1e-4)

    print("KERNEL_OK")
</pallas_src>

<mosaic_0001>
module attributes {stable_mosaic.version = 11 : i64} {
  func.func @_fused_kernel(%arg0: i32, %arg1: memref<8x256xf32, #tpu.memory_space<vmem>>, %arg2: memref<256x128xf32, #tpu.memory_space<vmem>>, %arg3: memref<1x128xf32, #tpu.memory_space<vmem>>, %arg4: memref<8x128xf32, #tpu.memory_space<vmem>>) attributes {dimension_semantics = [#tpu.dimension_semantics<parallel>], iteration_bounds = array<i64: 1>, scalar_prefetch = 0 : i64, scratch_operands = 0 : i64, tpu.core_type = #tpu.core_type<tc>, window_params = [{transform_indices = @transform_0, window_bounds = array<i64: 8, 256>}, {pipeline_mode = #tpu.pipeline_mode<synchronous>, transform_indices = @transform_1, window_bounds = array<i64: 256, 128>}, {pipeline_mode = #tpu.pipeline_mode<synchronous>, transform_indices = @transform_2, window_bounds = array<i64: 1, 128>}, {transform_indices = @transform_3, window_bounds = array<i64: 8, 128>}]} {
    %c0 = arith.constant 0 : index
    %c0_0 = arith.constant 0 : index
    %0 = vector.load %arg1[%c0, %c0_0] : memref<8x256xf32, #tpu.memory_space<vmem>>, vector<8x256xf32>
    %c0_1 = arith.constant 0 : index
    %c0_2 = arith.constant 0 : index
    %1 = vector.load %arg2[%c0_1, %c0_2] : memref<256x128xf32, #tpu.memory_space<vmem>>, vector<256x128xf32>
    %cst = arith.constant dense<0.000000e+00> : vector<8x128xf32>
    %2 = tpu.matmul %0, %1, %cst {dimension_numbers = #tpu.dot_dimension_numbers<[1], [0], [0], [1], [0, 0, 1, 1], [], []>} : vector<8x256xf32>, vector<256x128xf32>, vector<8x128xf32> -> vector<8x128xf32>
    %c0_3 = arith.constant 0 : index
    %c0_4 = arith.constant 0 : index
    %3 = vector.load %arg3[%c0_3, %c0_4] : memref<1x128xf32, #tpu.memory_space<vmem>>, vector<1x128xf32>
    %4 = vector.broadcast %3 : vector<1x128xf32> to vector<8x128xf32>
    %5 = arith.addf %2, %4 : vector<8x128xf32>
    %c0_5 = arith.constant 0 : index
    %c0_6 = arith.constant 0 : index
    %6 = vector.load %arg4[%c0_5, %c0_6] : memref<8x128xf32, #tpu.memory_space<vmem>>, vector<8x128xf32>
    tpu.vector_store %arg4[%c0_5, %c0_6], %5 {strides = array<i32>} : memref<8x128xf32, #tpu.memory_space<vmem>>, vector<8x128xf32>,
    return
  }
  func.func @transform_0(%arg0: i32) -> (i32, i32) {
    %c0_i32 = arith.constant 0 : i32
    %c0_i32_0 = arith.constant 0 : i32
    return %arg0, %c0_i32 : i32, i32
  }
  func.func @transform_1(%arg0: i32) -> (i32, i32) {
    %c0_i32 = arith.constant 0 : i32
    %c0_i32_0 = arith.constant 0 : i32
    %c0_i32_1 = arith.constant 0 : i32
    return %c0_i32, %c0_i32_0 : i32, i32
  }
  func.func @transform_2(%arg0: i32) -> (i32, i32) {
    %c0_i32 = arith.constant 0 : i32
    %c0_i32_0 = arith.constant 0 : i32
    %c0_i32_1 = arith.constant 0 : i32
    return %c0_i32, %c0_i32_0 : i32, i32
  }
  func.func @transform_3(%arg0: i32) -> (i32, i32) {
    %c0_i32 = arith.constant 0 : i32
    %c0_i32_0 = arith.constant 0 : i32
    return %arg0, %c0_i32 : i32, i32
  }
}

</mosaic_0001>

<bundles_post_ra>
// kernel: tpu_custom_call.1
= control target key start
LH: loop header
LB: loop body
LE: loop exit
PB: predicated region body
PF: predicated region fallthrough
CT: control target
= control target key end

     0   :  { %8 = vsyncpa [#allocation3], 0  ;;  %s263_s0 = inlined_call_operand.hbm [shape: f32[8,256], index: 0, kind: input, shape index: {}]   ;;  %s264_s1 = inlined_call_operand.hbm [shape: f32[256,128], index: 1, kind: input, shape index: {}]   ;;  %s265_s2 = inlined_call_operand.vmem [shape: f32[1,128], index: 2, kind: input, shape index: {}]   ;;  %s266_s3 = inlined_call_operand.hbm [shape: f32[8,128], index: 3, kind: output, shape index: {}]  }
   0x1   :  { %9 = vsyncpa [#allocation6], 0 }
   0x2   :  { %10 = vsyncpa [#allocation4], 0  ;;  %s16_s14 = sshll.u32 %s263_s0, 4  ;;  %s226_s15 = smov [#allocation2]   ;;  %s17_s14 = int_to_ptr.hbm [resolvable:$true] %s16_s14 }
   0x3   :  { %s18_s16 = sshll.u32 %s226_s15, 4  ;;  %s26_s19 = sshll.u32 %s264_s1, 4  ;;  %s19_s16 = int_to_ptr.vmem [resolvable:$true] %s18_s16  ;;  %s27_s19 = int_to_ptr.hbm [resolvable:$true] %s26_s19 }
   0x4   :  { %21 = dma.hbm_to_vmem [thread:$0]  %s17_s14, 256, %s19_s16, [#allocation3]  }
   0x5   :  { %s227_s20 = smov [#allocation5]   ;;  %s228_s22 = smov 128  }
   0x6   :  { %s28_s21 = sshll.u32 %s227_s20, 4  ;;  %s229_s23 = smov 8   ;;  %s29_s21 = int_to_ptr.vmem [resolvable:$true] %s28_s21 }
   0x7   :  { %34 = dma.hbm_to_vmem [thread:$0]  %s27_s19, 4096, %s29_s21, [#allocation6], %s228_s22, %s228_s22, %s229_s23  }
   0x8   :  { %220 = dma.done.wait [#allocation3], 256  }
   0x9   :  { %221 = vsyncadd [#allocation3], 4294967040 }
   0xa   :  { %222 = dma.done.wait [#allocation6], 4096  }
   0xb   :  { %223 = vsyncadd [#allocation6], 4294963200  ;;  %v62_v0 = vld [vmem:[#allocation5 + $0x78] sm:$0xff]  ;;  %v61_v1 = vld [vmem:[#allocation5 + $0x70] sm:$0xff]  ;;  %s230_s24 = smov [#allocation7]   ;;  %s131_s28 = sshll.u32 %s266_s3, 4  ;;  %s132_s28 = int_to_ptr.hbm [resolvable:$true] %s131_s28 }
   0xc   :  { %v78_v2 = vld [vmem:[#allocation5 + $0xf8] sm:$0xff]  ;;  %83 = vmatpush.msra.mxu0 %v62_v0  ;;  %v77_v3 = vld [vmem:[#allocation5 + $0xf0] sm:$0xff]  ;;  %v60_v4 = vld [vmem:[#allocation5 + $0x68] sm:$0xff]  ;;  %s129_s25 = sshll.u32 %s230_s24, 4  ;;  %s130_s25 = int_to_ptr.vmem [resolvable:$true] %s129_s25 }
   0xd   :  { %103 = vmatpush.msra.mxu1 %v78_v2  ;;  %v76_v5 = vld [vmem:[#allocation5 + $0xe8] sm:$0xff]  ;;  %v59_v6 = vld [vmem:[#allocation5 + $0x60] sm:$0xff]  ;;  %v58_v8 = vld [vmem:[#allocation5 + $0x58] sm:$0xff] }
   0xe   :  { %84 = vmatpush.msra.mxu0 %v61_v1  ;;  %v75_v7 = vld [vmem:[#allocation5 + $0xe0] sm:$0xff]  ;;  %v74_v9 = vld [vmem:[#allocation5 + $0xd8] sm:$0xff]  ;;  %v57_v10 = vld [vmem:[#allocation5 + $0x50] sm:$0xff] }
   0xf   :  { %104 = vmatpush.msra.mxu1 %v77_v3  ;;  %v73_v11 = vld [vmem:[#allocation5 + $0xd0] sm:$0xff]  ;;  %v56_v12 = vld [vmem:[#allocation5 + $0x48] sm:$0xff]  ;;  %v55_v14 = vld [vmem:[#allocation5 + $0x40] sm:$0xff] }
  0x10   :  { %85 = vmatpush.msra.mxu0 %v60_v4  ;;  %v72_v13 = vld [vmem:[#allocation5 + $0xc8] sm:$0xff]  ;;  %v71_v15 = vld [vmem:[#allocation5 + $0xc0] sm:$0xff]  ;;  %v54_v16 = vld [vmem:[#allocation5 + $0x38] sm:$0xff] }
  0x11   :  { %105 = vmatpush.msra.mxu1 %v76_v5  ;;  %v70_v17 = vld [vmem:[#allocation5 + $0xb8] sm:$0xff]  ;;  %v53_v18 = vld [vmem:[#allocation5 + $0x30] sm:$0xff]  ;;  %v52_v20 = vld [vmem:[#allocation5 + $0x28] sm:$0xff] }
  0x12   :  { %86 = vmatpush.msra.mxu0 %v59_v6  ;;  %v69_v19 = vld [vmem:[#allocation5 + $0xb0] sm:$0xff]  ;;  %v68_v21 = vld [vmem:[#allocation5 + $0xa8] sm:$0xff]  ;;  %v51_v22 = vld [vmem:[#allocation5 + $0x20] sm:$0xff] }
  0x13   :  { %106 = vmatpush.msra.mxu1 %v75_v7  ;;  %v67_v23 = vld [vmem:[#allocation5 + $0xa0] sm:$0xff]  ;;  %v50_v24 = vld [vmem:[#allocation5 + $0x18] sm:$0xff]  ;;  %v49_v26 = vld [vmem:[#allocation5 + $0x10] sm:$0xff] }
  0x14   :  { %87 = vmatpush.msra.mxu0 %v58_v8  ;;  %v66_v25 = vld [vmem:[#allocation5 + $0x98] sm:$0xff]  ;;  %v65_v27 = vld [vmem:[#allocation5 + $0x90] sm:$0xff]  ;;  %v48_v28 = vld [vmem:[#allocation5 + $0x8] sm:$0xff] }
  0x15   :  { %107 = vmatpush.msra.mxu1 %v74_v9  ;;  %v64_v29 = vld [vmem:[#allocation5 + $0x88] sm:$0xff]  ;;  %v47_v30 = vld [vmem:[#allocation5] sm:$0xff]  ;;  %v45_v32 = vld [vmem:[#allocation2] sm:$0xff] }
  0x16   :  { %88 = vmatpush.msra.mxu0 %v57_v10  ;;  %v63_v31 = vld [vmem:[#allocation5 + $0x80] sm:$0xff]  ;;  %v46_v33 = vld [vmem:[#allocation2 + $0x8] sm:$0xff]  ;;  %v147_v34 = vld [vmem:[%s265_s2] ss:$0 sm:$0xff] }
  0x17   :  { %108 = vmatpush.msra.mxu1 %v73_v11 }
  0x18   :  { %89 = vmatpush.msra.mxu0 %v56_v12 }
  0x19   :  { %109 = vmatpush.msra.mxu1 %v72_v13 }
  0x1a   :  { %90 = vmatpush.msra.mxu0 %v55_v14 }
  0x1b   :  { %110 = vmatpush.msra.mxu1 %v71_v15 }
  0x1c   :  { %91 = vmatpush.msra.mxu0 %v54_v16 }
  0x1d   :  { %111 = vmatpush.msra.mxu1 %v70_v17 }
  0x1e   :  { %92 = vmatpush.msra.mxu0 %v53_v18 }
  0x1f   :  { %112 = vmatpush.msra.mxu1 %v69_v19 }
  0x20   :  { %93 = vmatpush.msra.mxu0 %v52_v20 }
  0x21   :  { %113 = vmatpush.msra.mxu1 %v68_v21 }
  0x22   :  { %94 = vmatpush.msra.mxu0 %v51_v22 }
  0x23   :  { %114 = vmatpush.msra.mxu1 %v67_v23 }
  0x24   :  { %95 = vmatpush.msra.mxu0 %v50_v24 }
  0x25   :  { %115 = vmatpush.msra.mxu1 %v66_v25 }
  0x26   :  { %96 = vmatpush.msra.mxu0 %v49_v26 }
  0x27   :  { %116 = vmatpush.msra.mxu1 %v65_v27 }
  0x28   :  { %97 = vmatpush.msra.mxu0 %v48_v28 }
  0x29   :  { %117 = vmatpush.msra.mxu1 %v64_v29 }
  0x2a   :  { %98 = vmatpush.msra.mxu0 %v47_v30 }
  0x2b   :  { %118 = vmatpush.msra.mxu1 %v63_v31  ;;  %99 = vmatmul.f32.vlgmr.msra.gmra.mxu0 %v45_v32 }
  0x2c   :  { %119 = vmatmul.f32.vlgmr.msra.gmra.mxu1 %v46_v33 }
  0xa8   :  { %v100_v35 = vpop.f32.mrf.mxu0 }
  0xa9   :  { %v120_v36 = vpop.f32.mrf.mxu1  ;;  %v101_v37 = vadd.f32 %v147_v34, %v100_v35 }
  0xab   :  { %v121_v38 = vadd.f32 %v120_v36, %v101_v37 }
  0xad   :  { %123 = vst [vmem:[#allocation7] sm:$0xff] %v121_v38 }
  0xae   :  { %134 = dma.vmem_to_hbm [thread:$0]  %s130_s25, 128, %s132_s28, [#allocation4]  }
  0xaf   :  { %224 = dma.done.wait [#allocation4], 128  }
  0xb0   :  { %225 = vsyncadd [#allocation4], 4294967168 }
  0xb1   :  { %139 = vsyncpa [#allocation3], 1 }
  0xb2   :  { %140 = vsyncpa [#allocation6], 1 }
  0xb3   :  { %141 = vsyncpa [#allocation4], 1 }

</bundles_post_ra>
